<compile_context>
chip_gen: v7x
topology: tpu7x:2x2x1
jax: 0.10.0
libtpu: 0.0.40
codegen_flags: <defaults>
</compile_context>

<pallas_src>
import jax
import jax.numpy as jnp
from jax.experimental import pallas as pl
from jax.experimental.pallas import tpu as pltpu


def _round_up(x, m):
    return ((x + m - 1) // m) * m


def _cdiv(a, b):
    return -(-a // b)


def glu_kernel(x_ref, wa_ref, wg_ref, ba_ref, bg_ref, o_ref, acc_a, acc_g):
    # x_ref: (tm, tk), wa_ref/wg_ref: (tk, tn), ba_ref/bg_ref: (1, tn),
    # o_ref: (tm, tn), acc_a/acc_g: (tm, tn) f32 scratch.
    k = pl.program_id(2)

    @pl.when(k == 0)
    def _():
        acc_a[...] = jnp.zeros_like(acc_a)
        acc_g[...] = jnp.zeros_like(acc_g)

    x = x_ref[...]
    acc_a[...] += jnp.dot(x, wa_ref[...], preferred_element_type=jnp.float32)
    acc_g[...] += jnp.dot(x, wg_ref[...], preferred_element_type=jnp.float32)

    @pl.when(k == pl.num_programs(2) - 1)
    def _():
        a = acc_a[...] + ba_ref[...].astype(jnp.float32)
        g = acc_g[...] + bg_ref[...].astype(jnp.float32)
        o_ref[...] = (a * jax.nn.sigmoid(g)).astype(o_ref.dtype)


def glu_forward(x, weight, bias, *, tm=None, tn=None, tk=None):
    """GLU forward.

    x:      (B, T, D)
    weight: (D, 2D)  -- pre-transposed vs torch's (2D, D) Linear weight
    bias:   (2D,)
    """
    B, T, D = x.shape
    M = B * T
    dtype = x.dtype
    itemsize = jnp.dtype(dtype).itemsize
    sub = 16 if itemsize < 4 else 8  # sublane multiple (bf16 packs 2 rows)

    # ---- tile / padding derivation ------------------------------------
    Dp = _round_up(D, 128)  # lane-dense feature axis
    if tn is None:
        tn = 256 if Dp % 256 == 0 else 128
    if tk is None:
        tk = 512 if Dp % 512 == 0 else (256 if Dp % 256 == 0 else 128)
    assert Dp % tn == 0 and Dp % tk == 0

    Mp = _round_up(M, sub)
    if tm is None:
        if Mp >= 2 * 256:
            tm = 256
        elif Mp >= 2 * sub:
            tm = _round_up(_cdiv(Mp, 2), sub)  # ensure >=2 parallel M steps
        else:
            tm = sub
    Mp = _round_up(Mp, tm)

    # ---- pad operands (zero padding is exact for GLU) ------------------
    x2d = x.reshape(M, D)
    if (Mp, Dp) != (M, D):
        x2d = jnp.pad(x2d, ((0, Mp - M), (0, Dp - D)))

    wa = weight[:, :D]
    wg = weight[:, D:]
    ba = bias[:D].reshape(1, D)
    bg = bias[D:].reshape(1, D)
    if Dp != D:
        wa = jnp.pad(wa, ((0, Dp - D), (0, Dp - D)))
        wg = jnp.pad(wg, ((0, Dp - D), (0, Dp - D)))
        ba = jnp.pad(ba, ((0, 0), (0, Dp - D)))
        bg = jnp.pad(bg, ((0, 0), (0, Dp - D)))

    # ---- explicit VMEM budget (fits v7x 64 MiB; double-buffered IO) -----
    per_step = (tm * tk + 2 * tk * tn + tm * tn) * itemsize + 2 * tn * 4
    vmem_need = 2 * per_step + 2 * tm * tn * 4  # + f32 accumulators
    vmem_limit = int(min(64 << 20, max(32 << 20, 2 * vmem_need + (8 << 20))))

    # N outer, M inner, K (reduction) last.
    grid = (Dp // tn, Mp // tm, Dp // tk)

    out2d = pl.pallas_call(
        glu_kernel,
        out_shape=jax.ShapeDtypeStruct((Mp, Dp), dtype),
        grid_spec=pltpu.PrefetchScalarGridSpec(
            num_scalar_prefetch=0,
            grid=grid,
            in_specs=[
                pl.BlockSpec((tm, tk), lambda n, m, k: (m, k)),  # x row tile
                pl.BlockSpec((tk, tn), lambda n, m, k: (k, n)),  # W_a tile
                pl.BlockSpec((tk, tn), lambda n, m, k: (k, n)),  # W_g tile
                pl.BlockSpec((1, tn), lambda n, m, k: (0, n)),   # bias_a
                pl.BlockSpec((1, tn), lambda n, m, k: (0, n)),   # bias_g
            ],
            out_specs=pl.BlockSpec((tm, tn), lambda n, m, k: (m, n)),
            scratch_shapes=[
                pltpu.VMEM((tm, tn), jnp.float32),  # acc_a
                pltpu.VMEM((tm, tn), jnp.float32),  # acc_g
            ],
        ),
        compiler_params=pltpu.CompilerParams(
            dimension_semantics=("parallel", "parallel", "arbitrary"),
            vmem_limit_bytes=vmem_limit,
        ),
    )(x2d, wa, wg, ba, bg)

    return out2d[:M, :D].reshape(B, T, D)


def reference_glu(x, weight, bias):
    out = jnp.einsum("btd,df->btf", x, weight) + bias
    D = x.shape[2]
    return out[:, :, :D] * jax.nn.sigmoid(out[:, :, D:])


if __name__ == "__main__":
    B, T, D = 2, 8, 32

    key = jax.random.PRNGKey(0)
    kx, kw, kb = jax.random.split(key, 3)

    # Deterministic init mirroring torch.nn.Linear's uniform(-1/sqrt(D), 1/sqrt(D)).
    bound = 1.0 / (D ** 0.5)
    # PyTorch stores weight as (2D, D); we keep it pre-transposed as (D, 2D).
    weight = jax.random.uniform(kw, (D, 2 * D), jnp.float32, -bound, bound)
    bias = jax.random.uniform(kb, (2 * D,), jnp.float32, -bound, bound)
    x = jax.random.normal(kx, (B, T, D), jnp.float32)

    # f32 path: tight check against the reference.
    out = jax.block_until_ready(glu_forward(x, weight, bias))
    ref = reference_glu(x, weight, bias)
    assert out.shape == (B, T, D)
    assert jnp.allclose(out, ref, atol=1e-5, rtol=1e-5), "f32 mismatch vs reference"

    # bf16 activations/weights (MXU peak dtype), still f32 accumulation in-kernel.
    xb = x.astype(jnp.bfloat16)
    wb = weight.astype(jnp.bfloat16)
    out_bf16 = jax.block_until_ready(glu_forward(xb, wb, bias))
    ref_bf16 = reference_glu(xb.astype(jnp.float32), wb.astype(jnp.float32), bias)
    assert out_bf16.shape == (B, T, D)
    assert jnp.allclose(out_bf16.astype(jnp.float32), ref_bf16, atol=3e-2, rtol=3e-2), \
        "bf16 mismatch vs reference"

    print("KERNEL_OK")
</pallas_src>

<mosaic_0001>
module attributes {stable_mosaic.version = 11 : i64} {
  func.func @glu_kernel(%arg0: i32, %arg1: i32, %arg2: i32, %arg3: memref<8x128xf32, #tpu.memory_space<vmem>>, %arg4: memref<128x128xf32, #tpu.memory_space<vmem>>, %arg5: memref<128x128xf32, #tpu.memory_space<vmem>>, %arg6: memref<1x128xf32, #tpu.memory_space<vmem>>, %arg7: memref<1x128xf32, #tpu.memory_space<vmem>>, %arg8: memref<8x128xf32, #tpu.memory_space<vmem>>, %arg9: memref<8x128xf32, #tpu.memory_space<vmem>>, %arg10: memref<8x128xf32, #tpu.memory_space<vmem>>) attributes {dimension_semantics = [#tpu.dimension_semantics<parallel>, #tpu.dimension_semantics<parallel>, #tpu.dimension_semantics<arbitrary>], iteration_bounds = array<i64: 1, 2, 1>, scalar_prefetch = 0 : i64, scratch_operands = 2 : i64, tpu.core_type = #tpu.core_type<tc>, window_params = [{transform_indices = @transform_0, window_bounds = array<i64: 8, 128>}, {transform_indices = @transform_1, window_bounds = array<i64: 128, 128>}, {transform_indices = @transform_2, window_bounds = array<i64: 128, 128>}, {transform_indices = @transform_3, window_bounds = array<i64: 1, 128>}, {transform_indices = @transform_4, window_bounds = array<i64: 1, 128>}, {transform_indices = @transform_5, window_bounds = array<i64: 8, 128>}]} {
    %c0_i32 = arith.constant 0 : i32
    %0 = arith.cmpi eq, %arg2, %c0_i32 : i32
    %1 = arith.extui %0 : i1 to i32
    %c0_i32_0 = arith.constant 0 : i32
    %2 = arith.cmpi ne, %1, %c0_i32_0 : i32
    scf.if %2 {
      %cst_17 = arith.constant 0.000000e+00 : f32
      %17 = vector.broadcast %cst_17 : f32 to vector<8x128xf32>
      %c0_18 = arith.constant 0 : index
      %c0_19 = arith.constant 0 : index
      %18 = vector.load %arg9[%c0_18, %c0_19] : memref<8x128xf32, #tpu.memory_space<vmem>>, vector<8x128xf32>
      tpu.vector_store %arg9[%c0_18, %c0_19], %17 {strides = array<i32>} : memref<8x128xf32, #tpu.memory_space<vmem>>, vector<8x128xf32>,
      %cst_20 = arith.constant 0.000000e+00 : f32
      %19 = vector.broadcast %cst_20 : f32 to vector<8x128xf32>
      %c0_21 = arith.constant 0 : index
      %c0_22 = arith.constant 0 : index
      %20 = vector.load %arg10[%c0_21, %c0_22] : memref<8x128xf32, #tpu.memory_space<vmem>>, vector<8x128xf32>
      tpu.vector_store %arg10[%c0_21, %c0_22], %19 {strides = array<i32>} : memref<8x128xf32, #tpu.memory_space<vmem>>, vector<8x128xf32>,
    } else {
    }
    %c0 = arith.constant 0 : index
    %c0_1 = arith.constant 0 : index
    %3 = vector.load %arg3[%c0, %c0_1] : memref<8x128xf32, #tpu.memory_space<vmem>>, vector<8x128xf32>
    %c0_2 = arith.constant 0 : index
    %c0_3 = arith.constant 0 : index
    %4 = vector.load %arg9[%c0_2, %c0_3] : memref<8x128xf32, #tpu.memory_space<vmem>>, vector<8x128xf32>
    %c0_4 = arith.constant 0 : index
    %c0_5 = arith.constant 0 : index
    %5 = vector.load %arg4[%c0_4, %c0_5] : memref<128x128xf32, #tpu.memory_space<vmem>>, vector<128x128xf32>
    %cst = arith.constant dense<0.000000e+00> : vector<8x128xf32>
    %6 = tpu.matmul %3, %5, %cst {dimension_numbers = #tpu.dot_dimension_numbers<[1], [0], [0], [1], [0, 0, 1, 1], [], []>} : vector<8x128xf32>, vector<128x128xf32>, vector<8x128xf32> -> vector<8x128xf32>
    %7 = arith.addf %4, %6 : vector<8x128xf32>
    %c0_6 = arith.constant 0 : index
    %c0_7 = arith.constant 0 : index
    %8 = vector.load %arg9[%c0_6, %c0_7] : memref<8x128xf32, #tpu.memory_space<vmem>>, vector<8x128xf32>
    tpu.vector_store %arg9[%c0_6, %c0_7], %7 {strides = array<i32>} : memref<8x128xf32, #tpu.memory_space<vmem>>, vector<8x128xf32>,
    %c0_8 = arith.constant 0 : index
    %c0_9 = arith.constant 0 : index
    %9 = vector.load %arg10[%c0_8, %c0_9] : memref<8x128xf32, #tpu.memory_space<vmem>>, vector<8x128xf32>
    %c0_10 = arith.constant 0 : index
    %c0_11 = arith.constant 0 : index
    %10 = vector.load %arg5[%c0_10, %c0_11] : memref<128x128xf32, #tpu.memory_space<vmem>>, vector<128x128xf32>
    %cst_12 = arith.constant dense<0.000000e+00> : vector<8x128xf32>
    %11 = tpu.matmul %3, %10, %cst_12 {dimension_numbers = #tpu.dot_dimension_numbers<[1], [0], [0], [1], [0, 0, 1, 1], [], []>} : vector<8x128xf32>, vector<128x128xf32>, vector<8x128xf32> -> vector<8x128xf32>
    %12 = arith.addf %9, %11 : vector<8x128xf32>
    %c0_13 = arith.constant 0 : index
    %c0_14 = arith.constant 0 : index
    %13 = vector.load %arg10[%c0_13, %c0_14] : memref<8x128xf32, #tpu.memory_space<vmem>>, vector<8x128xf32>
    tpu.vector_store %arg10[%c0_13, %c0_14], %12 {strides = array<i32>} : memref<8x128xf32, #tpu.memory_space<vmem>>, vector<8x128xf32>,
    %c0_i32_15 = arith.constant 0 : i32
    %14 = arith.cmpi eq, %arg2, %c0_i32_15 : i32
    %15 = arith.extui %14 : i1 to i32
    %c0_i32_16 = arith.constant 0 : i32
    %16 = arith.cmpi ne, %15, %c0_i32_16 : i32
    scf.if %16 {
      %c0_17 = arith.constant 0 : index
      %c0_18 = arith.constant 0 : index
      %17 = vector.load %arg9[%c0_17, %c0_18] : memref<8x128xf32, #tpu.memory_space<vmem>>, vector<8x128xf32>
      %c0_19 = arith.constant 0 : index
      %c0_20 = arith.constant 0 : index
      %18 = vector.load %arg6[%c0_19, %c0_20] : memref<1x128xf32, #tpu.memory_space<vmem>>, vector<1x128xf32>
      %19 = vector.broadcast %18 : vector<1x128xf32> to vector<8x128xf32>
      %20 = arith.addf %17, %19 : vector<8x128xf32>
      %c0_21 = arith.constant 0 : index
      %c0_22 = arith.constant 0 : index
      %21 = vector.load %arg10[%c0_21, %c0_22] : memref<8x128xf32, #tpu.memory_space<vmem>>, vector<8x128xf32>
      %c0_23 = arith.constant 0 : index
      %c0_24 = arith.constant 0 : index
      %22 = vector.load %arg7[%c0_23, %c0_24] : memref<1x128xf32, #tpu.memory_space<vmem>>, vector<1x128xf32>
      %23 = vector.broadcast %22 : vector<1x128xf32> to vector<8x128xf32>
      %24 = arith.addf %21, %23 : vector<8x128xf32>
      %25 = arith.negf %24 : vector<8x128xf32>
      %26 = math.exp %25 : vector<8x128xf32>
      %cst_25 = arith.constant 1.000000e+00 : f32
      %27 = vector.broadcast %cst_25 : f32 to vector<8x128xf32>
      %28 = arith.addf %27, %26 : vector<8x128xf32>
      %29 = arith.divf %27, %28 : vector<8x128xf32>
      %30 = arith.mulf %20, %29 : vector<8x128xf32>
      %c0_26 = arith.constant 0 : index
      %c0_27 = arith.constant 0 : index
      %31 = vector.load %arg8[%c0_26, %c0_27] : memref<8x128xf32, #tpu.memory_space<vmem>>, vector<8x128xf32>
      tpu.vector_store %arg8[%c0_26, %c0_27], %30 {strides = array<i32>} : memref<8x128xf32, #tpu.memory_space<vmem>>, vector<8x128xf32>,
    } else {
    }
    return
  }
  func.func @transform_0(%arg0: i32, %arg1: i32, %arg2: i32) -> (i32, i32) {
    %c0_i32 = arith.constant 0 : i32
    return %arg1, %arg2 : i32, i32
  }
  func.func @transform_1(%arg0: i32, %arg1: i32, %arg2: i32) -> (i32, i32) {
    %c0_i32 = arith.constant 0 : i32
    return %arg2, %arg0 : i32, i32
  }
  func.func @transform_2(%arg0: i32, %arg1: i32, %arg2: i32) -> (i32, i32) {
    %c0_i32 = arith.constant 0 : i32
    return %arg2, %arg0 : i32, i32
  }
  func.func @transform_3(%arg0: i32, %arg1: i32, %arg2: i32) -> (i32, i32) {
    %c0_i32 = arith.constant 0 : i32
    %c0_i32_0 = arith.constant 0 : i32
    return %c0_i32, %arg0 : i32, i32
  }
  func.func @transform_4(%arg0: i32, %arg1: i32, %arg2: i32) -> (i32, i32) {
    %c0_i32 = arith.constant 0 : i32
    %c0_i32_0 = arith.constant 0 : i32
    return %c0_i32, %arg0 : i32, i32
  }
  func.func @transform_5(%arg0: i32, %arg1: i32, %arg2: i32) -> (i32, i32) {
    %c0_i32 = arith.constant 0 : i32
    return %arg1, %arg0 : i32, i32
  }
}

</mosaic_0001>

<bundles_post_ra>
// kernel: tpu_custom_call.1
= control target key start
LH: loop header
LB: loop body
LE: loop exit
PB: predicated region body
PF: predicated region fallthrough
CT: control target
= control target key end

     0   :  { %10 = vsyncpa [#allocation5], 0  ;;  %s1466_s0 = inlined_call_operand.hbm [shape: f32[16,128], index: 0, kind: input, shape index: {}]   ;;  %s1467_s1 = inlined_call_operand.hbm [shape: f32[128,128], index: 1, kind: input, shape index: {}]   ;;  %s1468_s2 = inlined_call_operand.hbm [shape: f32[128,128], index: 2, kind: input, shape index: {}]   ;;  %s1469_s3 = inlined_call_operand.vmem [shape: f32[1,128], index: 3, kind: input, shape index: {}]   ;;  %s1470_s4 = inlined_call_operand.vmem [shape: f32[1,128], index: 4, kind: input, shape index: {}]   ;;  %s1471_s5 = inlined_call_operand.hbm [shape: f32[16,128], index: 5, kind: output, shape index: {}]  }
   0x1   :  { %12 = vsyncpa [#allocation5 + $0x1], 0 }
   0x2   :  { %13 = vsyncpa [#allocation8], 0 }
   0x3   :  { %14 = vsyncpa [#allocation6], 0 }
   0x4   :  { %16 = vsyncpa [#allocation6 + $0x1], 0  ;;  %s1187_s18 = smov 0   ;;  %s1189_s19 = smov 0  }
   0x5   :  { %s1191_s20 = smov 0   ;;  %s1193_s21 = smov 0  }
   0x6   :  { %s1195_s22 = smov 0   ;;  %s1197_s23 = smov 0  }
   0x7 LB: > { %s708_s24 = sadd.s32 4294967295, %s1146_s23   ;;  %s709_s25 = sadd.s32 4294967294, %s1146_s23   ;;  %s1146_s23 = sphi %s1197_s23, %s22_s23   ;;  %s1142_s22 = sphi %s1195_s22, %s1493_s22   ;;  %s1138_s21 = sphi %s1193_s21, %s1492_s21   ;;  %s1134_s20 = sphi %s1191_s20, %s1491_s20   ;;  %s1130_s19 = sphi %s1189_s19, %s1490_s19   ;;  %s1126_s18 = sphi %s1187_s18, %s1489_s18  }
   0x8   : > { %p63_p0 = scmp.ne.s32.totalorder %s1130_s19, %s1126_s18  ;;  %p1221_p1 = scmp.eq.s32.totalorder %s708_s24, 0 }
   0x9   : > { %p1225_p2 = scmp.eq.s32.totalorder %s708_s24, 1  ;;  %p203_p3 = scmp.eq.s32.totalorder %s709_s25, 1 }
   0xa   : > { %s1476_s26 = scalar_select %p1221_p1, 1, 0 }
   0xb   : > { %p1231_p4 = por %p1221_p1, %p63_p0  ;;  %p710_p5 = scmp.ge.s32.totalorder %s1146_s23, 1 }
   0xc   : > { %p1236_p6 = por %p203_p3, %p63_p0  ;;  %p210_p7 = scmp.lt.s32.totalorder %s1146_s23, 3 }
   0xd   : > { %s1478_s28 = scalar_select %p1231_p4, 1, 0 }
   0xe   : > { %s1479_s29 = scalar_select %p1236_p6, 1, 0 }
   0xf   : > { %p1241_p8 = pnand %p710_p5, %p210_p7  ;;  %s1148_s6 = smov [#allocation7]  }
  0x10   : > { %s226_s7 = sshll.u32 %s1148_s6, 4  ;;  %s1149_s9 = smov [#allocation9]   ;;  %s1245_s7 = int_to_ptr.vmem [resolvable:$true] %s226_s7 }
  0x11   : > { %p894_p9 = pneg %p1241_p8  ;;  %s243_s10 = sshll.u32 %s1149_s9, 4  ;;  %s1256_s10 = int_to_ptr.vmem [resolvable:$true] %s243_s10 }
  0x12   : > { %s974_s13 = scalar_lea.hbm %s1467_s1, 2048 }
  0x13   : > { %p1252_p11 = pnand %p894_p9, %p1221_p1  ;;  %p975_p12 = scmp.ne.s32.totalorder %s1467_s1, %s974_s13 }
  0x14   : > { %p981_p5 = scmp.lt.u32.totalorder %s974_s13, %s1467_s1 }
  0x15   : > { %p976_p13 = pneg %p1252_p11 }
  0x17   : > { %p977_p0 = pnand %p976_p13, %p975_p12 }
  0x19   : > { %p978_p3 = pneg %p977_p0 }
  0x1b   : > { %p983_p7 = pnand %p981_p5, %p978_p3 }
  0x1d   : > { %986 = shalt.err (!%p983_p7)
}
  0x1e   : > { %s987_s24 = scalar_lea.vmem %s1245_s7, 2048  ;;  %p995_p1 = scmp.lt.s32.totalorder %s1245_s7, %s1245_s7 }
  0x1f   : > { %p988_p9 = scmp.ne.s32.totalorder %s1245_s7, %s987_s24  ;;  %p996_p12 = scmp.lt.s32.totalorder %s987_s24, %s987_s24 }
  0x21   : > { %p990_p10 = pnand %p988_p9, %p976_p13  ;;  %p997_p0 = por %p996_p12, %p995_p1 }
  0x23   : > { %p991_p6 = pneg %p990_p10 }
  0x25   : > { %p998_p4 = pnand %p997_p0, %p991_p6 }
  0x27   : > { %1001 = shalt.err (!%p998_p4)
}
  0x28   : > { %s1150_s25 = smov 128   ;;  %s1151_s6 = smov 8  }
  0x29   : > { %897 = dma.hbm_to_vmem [thread:$0]  (!%p1252_p11), %s1467_s1, 2048, %s1245_s7, [#allocation8], %s1150_s25, %s1150_s25, %s1151_s6  }
  0x2a   : > { %s1002_s14 = scalar_lea.hbm %s1468_s2, 2048 }
  0x2b   : > { %p1003_p1 = scmp.ne.s32.totalorder %s1468_s2, %s1002_s14  ;;  %p1009_p10 = scmp.lt.u32.totalorder %s1002_s14, %s1468_s2 }
  0x2d   : > { %p1005_p4 = pnand %p1003_p1, %p976_p13 }
  0x2f   : > { %p1006_p6 = pneg %p1005_p4 }
  0x31   : > { %p1011_p3 = pnand %p1009_p10, %p1006_p6 }
  0x33   : > { %1014 = shalt.err (!%p1011_p3)
}
  0x34   : > { %s1015_s7 = scalar_lea.vmem %s1256_s10, 2048  ;;  %p1023_p12 = scmp.lt.s32.totalorder %s1256_s10, %s1256_s10 }
  0x35   : > { %p1016_p5 = scmp.ne.s32.totalorder %s1256_s10, %s1015_s7  ;;  %p1024_p0 = scmp.lt.s32.totalorder %s1015_s7, %s1015_s7 }
  0x37   : > { %p1018_p7 = pnand %p1016_p5, %p976_p13  ;;  %p1025_p1 = por %p1024_p0, %p1023_p12 }
  0x39   : > { %p1019_p9 = pneg %p1018_p7 }
  0x3b   : > { %p1026_p4 = pnand %p1025_p1, %p1019_p9 }
  0x3d   : > { %1029 = shalt.err (!%p1026_p4)
}
  0x3e   : > { %900 = dma.hbm_to_vmem [thread:$0]  (!%p1252_p11), %s1468_s2, 2048, %s1256_s10, [#allocation8], %s1150_s25, %s1150_s25, %s1151_s6  }
  0x3f   : > { %s37_s12 = sadd.s32 1, %s1142_s22  ;;  %s50_s13 = sadd.s32 1, %s1134_s20 }
  0x40   : > { %p39_p13 = scmp.ge.s32.totalorder %s37_s12, 2  ;;  %p57_p6 = scmp.ne.s32.totalorder %s1134_s20, %s1130_s19 }
  0x41   : > { %p58_p10 = scmp.eq.s32.totalorder %s1146_s23, 0  ;;  %p911_p3 = scmp.lt.s32.totalorder %s1146_s23, 2 }
  0x42   : > { %s1495_s12 = smov (%p39_p13, %s37_s12), 0  ;;  %p1320_p7 = por %p1225_p2, %p57_p6 }
  0x43   : > { %p59_p5 = por %p58_p10, %p57_p6  ;;  %s45_s14 = ssub.s32 %s1142_s22, %s1495_s12 }
  0x44   : > { %s1482_s8 = scalar_select %p1320_p7, 1, 0 }
  0x45   : > { %s269_s15 = sand.u32 1, %s1134_s20   ;;  %p48_p9 = scmp.eq.s32.totalorder %s45_s14, 0 }
  0x46   : > { %s716_s10 = sshll.u32 %s269_s15, 3  ;;  %s717_s25 = sshll.u32 %s1142_s22, 7 }
  0x47   : > { %s1329_s6 = scalar_select %p48_p9, %s1134_s20, %s50_s13  }
  0x48   : > { %s1334_s24 = scalar_lea.hbm %s1466_s0, %s717_s25  ;;  %s273_s27 = scalar_lea.vmem [#allocation4], %s716_s10 }
  0x49   : > { %s281_s7 = sshll.u32 %s273_s27, 4  ;;  %p1338_p2 = pnand %p911_p3, %p59_p5  ;;  %s1342_s7 = int_to_ptr.vmem [resolvable:$true] %s281_s7 }
  0x4a   : > { %s270_s11 = scalar_lea.sflag [#allocation5], %s269_s15  ;;  %s1030_s13 = scalar_lea.hbm %s1334_s24, 128 }
  0x4b   : > { %p1031_p11 = scmp.ne.s32.totalorder %s1334_s24, %s1030_s13  ;;  %p1032_p12 = pneg %p1338_p2 }
  0x4c   : > { %s1035_s25 = scalar_lea.hbm %s1466_s0, 256  ;;  %p1036_p4 = scmp.lt.u32.totalorder %s1334_s24, %s1466_s0 }
  0x4d   : > { %p1033_p0 = pnand %p1032_p12, %p1031_p11  ;;  %p1037_p13 = scmp.lt.u32.totalorder %s1035_s25, %s1030_s13 }
  0x4e   : > { %p1039_p10 = scmp.lt.u32.totalorder %s1030_s13, %s1334_s24 }
  0x4f   : > { %p1034_p1 = pneg %p1033_p0  ;;  %p1038_p6 = por %p1037_p13, %p1036_p4 }
  0x51   : > { %p1040_p3 = por %p1039_p10, %p1038_p6 }
  0x53   : > { %p1041_p5 = pnand %p1040_p3, %p1034_p1 }
  0x55   : > { %1044 = shalt.err (!%p1041_p5)
}
  0x56   : > { %s1045_s15 = scalar_lea.vmem %s1342_s7, 128  ;;  %s1152_s27 = smov [#allocation4]  }
  0x57   : > { %p1046_p9 = scmp.ne.s32.totalorder %s1342_s7, %s1045_s15  ;;  %s1050_s14 = sshll.u32 %s1152_s27, 4  ;;  %s1051_s14 = int_to_ptr.vmem [resolvable:$false] %s1050_s14 }
  0x58   : > { %s1052_s10 = scalar_lea.vmem %s1051_s14, 256  ;;  %p1053_p7 = scmp.lt.s32.totalorder %s1342_s7, %s1051_s14 }
  0x59   : > { %p1048_p11 = pnand %p1046_p9, %p1032_p12  ;;  %p1054_p4 = scmp.lt.s32.totalorder %s1052_s10, %s1045_s15 }
  0x5b   : > { %p1049_p0 = pneg %p1048_p11  ;;  %p1055_p13 = por %p1054_p4, %p1053_p7 }
  0x5d   : > { %p1056_p6 = pnand %p1055_p13, %p1049_p0 }
  0x5f   : > { %1059 = shalt.err (!%p1056_p6)
}
  0x60   : > { %904 = dma.hbm_to_vmem [thread:$0]  (!%p1338_p2), %s1334_s24, 128, %s1342_s7, %s270_s11  }
  0x61   : > { %290 = sbr.rel (%p1241_p8) target bundleno = 399 (0x18f), region = 40  ;;  %s1372_s13 = sand.u32 (!%p1241_p8), 1, %s1130_s19  }
  0x62   : > { %s719_s25 = sshll.u32 (!%p1241_p8), %s1372_s13, 3  ;;  %s293_s16 = scalar_lea.sflag (!%p1241_p8), [#allocation5], %s1372_s13 }
  0x63   : > { %s1378_s17 = scalar_lea.vmem (!%p1241_p8), [#allocation4], %s719_s25  ;;  %p1484_p7 = scmp.ne.s32.totalorder (!%p1241_p8), %s1478_s28, 0 }
  0x68   : > { %1113 = dma.done.wait (%p1484_p7), %s293_s16, 128  }
  0x69   : > { %1115 = vsyncadd (%p1484_p7), %s293_s16, 4294967168  ;;  %p1485_p2 = scmp.ne.s32.totalorder %s1476_s26, 0 }
  0x6b   : > { %1117 = dma.done.wait (%p1485_p2), [#allocation8], 4096  }
  0x6c   : > { %1119 = vsyncadd (%p1485_p2), [#allocation8], 4294963200  ;;  %v1153_v0 = vmov 0.0|0.0   ;;  %vm1154_vm0 = vmmov 0   ;;  %v1155_v1 = vmov 0.0   ;;  %v442_v2 = vld [vmem:[#allocation9] sm:$0xff] }
  0x6d   : > { %858 = vmatprep.subr.bf16.mxu1 %v1153_v0  ;;  %834 = vmatprep.subr.bf16.mxu0 %v1153_v0  ;;  %v443_v3 = vld [vmem:[#allocation9 + $0x8] sm:$0xff]  ;;  %v444_v4 = vld [vmem:[#allocation9 + $0x10] sm:$0xff]  ;;  %v445_v6 = vld [vmem:[#allocation9 + $0x18] sm:$0xff]  ;;  %s727_s7 = sshll.u32 %s1138_s21, 7  ;;  %s336_s9 = scalar_lea.vmem [#allocation10], %s719_s25 }
  0x6e   : > { %831 = vmatprep.mubr.msk.f32.mxu1 %vm1154_vm0, %v1155_v1  ;;  %796 = vmatprep.mubr.msk.f32.mxu0 %vm1154_vm0, %v1155_v1  ;;  %v859_v5 = vpack.c.bf16 %v443_v3, %v442_v2  ;;  %v862_v7 = vpack.c.bf16 %v445_v6, %v444_v4  ;;  %v446_v8 = vld [vmem:[#allocation9 + $0x20] sm:$0xff]  ;;  %v447_v9 = vld [vmem:[#allocation9 + $0x28] sm:$0xff]  ;;  %v355_v13 = vld [vmem:[#allocation7 + $0x10] sm:$0xff]  ;;  %s574_s11 = sshll.u32 %s336_s9, 4  ;;  %s1417_s14 = scalar_lea.hbm %s1471_s5, %s727_s7  ;;  %s1419_s11 = int_to_ptr.vmem [resolvable:$true] %s574_s11 }
  0x6f   : > { %v353_v10 = vld [vmem:[#allocation7] sm:$0xff]  ;;  %v354_v11 = vld [vmem:[#allocation7 + $0x8] sm:$0xff]  ;;  %v356_v14 = vld [vmem:[#allocation7 + $0x18] sm:$0xff]  ;;  %v865_v15 = vpack.c.bf16 %v447_v9, %v446_v8  ;;  %s560_s10 = scalar_lea.sflag [#allocation6], %s1372_s13  ;;  %s1060_s16 = scalar_lea.vmem %s1419_s11, 128 }
  0x70   : > { %860 = vmatpush3.bf16.msra.mxu1 %v859_v5  ;;  %v835_v12 = vpack.c.bf16 %v354_v11, %v353_v10  ;;  %v448_v16 = vld [vmem:[#allocation9 + $0x30] sm:$0xff]  ;;  %v449_v17 = vld [vmem:[#allocation9 + $0x38] sm:$0xff]  ;;  %v838_v18 = vpack.c.bf16 %v356_v14, %v355_v13  ;;  %v357_v19 = vld [vmem:[#allocation7 + $0x20] sm:$0xff]  ;;  %p1061_p8 = scmp.ne.s32.totalorder %s1419_s11, %s1060_s16  ;;  %p1486_p12 = scmp.ne.s32.totalorder %s1482_s8, 0 }
  0x71   : > { %861 = vmatprep.subr.bf16.mxu1 %v1153_v0  ;;  %v358_v20 = vld [vmem:[#allocation7 + $0x28] sm:$0xff]  ;;  %v868_v21 = vpack.c.bf16 %v449_v17, %v448_v16  ;;  %v450_v22 = vld [vmem:[#allocation9 + $0x40] sm:$0xff]  ;;  %v359_v25 = vld [vmem:[#allocation7 + $0x30] sm:$0xff]  ;;  %s1156_s21 = smov [#allocation10]  }
  0x72   : > { %836 = vmatpush3.bf16.msra.mxu0 %v835_v12  ;;  %v451_v23 = vld [vmem:[#allocation9 + $0x48] sm:$0xff]  ;;  %v841_v24 = vpack.c.bf16 %v358_v20, %v357_v19  ;;  %v360_v26 = vld [vmem:[#allocation7 + $0x38] sm:$0xff]  ;;  %v452_v28 = vld [vmem:[#allocation9 + $0x50] sm:$0xff]  ;;  %p1062_p1 = pnand %p1061_p8, %p1486_p12  ;;  %s1064_s25 = sshll.u32 %s1156_s21, 4  ;;  %s1065_s25 = int_to_ptr.vmem [resolvable:$false] %s1064_s25 }
  0x73   : > { %837 = vmatprep.subr.bf16.mxu0 %v1153_v0  ;;  %v871_v27 = vpack.c.bf16 %v451_v23, %v450_v22  ;;  %v453_v29 = vld [vmem:[#allocation9 + $0x58] sm:$0xff]  ;;  %v844_v30 = vpack.c.bf16 %v360_v26, %v359_v25  ;;  %v361_v31 = vld [vmem:[#allocation7 + $0x40] sm:$0xff]  ;;  %v362_v32 = vld [vmem:[#allocation7 + $0x48] sm:$0xff]  ;;  %p1067_p3 = scmp.lt.s32.totalorder %s1419_s11, %s1065_s25 }
  0x74   : > { %863 = vmatpush3.bf16.msra.mxu1 %v862_v7  ;;  %v874_v33 = vpack.c.bf16 %v453_v29, %v452_v28  ;;  %v454_v34 = vld [vmem:[#allocation9 + $0x60] sm:$0xff]  ;;  %v455_v35 = vld [vmem:[#allocation9 + $0x68] sm:$0xff]  ;;  %v847_v36 = vpack.c.bf16 %v362_v32, %v361_v31  ;;  %v363_v37 = vld [vmem:[#allocation7 + $0x50] sm:$0xff]  ;;  %p1063_p10 = pneg %p1062_p1 }
  0x75   : > { %864 = vmatprep.subr.bf16.mxu1 %v1153_v0  ;;  %v364_v38 = vld [vmem:[#allocation7 + $0x58] sm:$0xff]  ;;  %v877_v39 = vpack.c.bf16 %v455_v35, %v454_v34  ;;  %v456_v40 = vld [vmem:[#allocation9 + $0x70] sm:$0xff]  ;;  %v365_v43 = vld [vmem:[#allocation7 + $0x60] sm:$0xff] }
  0x76   : > { %839 = vmatpush3.bf16.msra.mxu0 %v838_v18  ;;  %v457_v41 = vld [vmem:[#allocation9 + $0x78] sm:$0xff]  ;;  %v850_v42 = vpack.c.bf16 %v364_v38, %v363_v37  ;;  %v366_v44 = vld [vmem:[#allocation7 + $0x68] sm:$0xff]  ;;  %v367_v47 = vld [vmem:[#allocation7 + $0x70] sm:$0xff] }
  0x77   : > { %840 = vmatprep.subr.bf16.mxu0 %v1153_v0  ;;  %v880_v45 = vpack.c.bf16 %v457_v41, %v456_v40  ;;  %v853_v46 = vpack.c.bf16 %v366_v44, %v365_v43  ;;  %v368_v48 = vld [vmem:[#allocation7 + $0x78] sm:$0xff]  ;;  %v724_v51 = vld [vmem:[%s1470_s4] ss:$0 sm:$0xff] }
  0x78   : > { %866 = vmatpush3.bf16.msra.mxu1 %v865_v15  ;;  %v351_v49 = vld [vmem:[%s1378_s17] sm:$0xff]  ;;  %v856_v50 = vpack.c.bf16 %v368_v48, %v367_v47  ;;  %s1066_s17 = scalar_lea.vmem %s1065_s25, 256 }
  0x79   : > { %867 = vmatprep.subr.bf16.mxu1 %v1153_v0  ;;  %v723_v60 = vld [vmem:[%s1469_s3] ss:$0 sm:$0xff]  ;;  %p1068_p5 = scmp.lt.s32.totalorder %s1066_s17, %s1060_s16 }
  0x7a   : > { %842 = vmatpush3.bf16.msra.mxu0 %v841_v24 }
  0x7b   : > { %843 = vmatprep.subr.bf16.mxu0 %v1153_v0  ;;  %p1069_p9 = por %p1068_p5, %p1067_p3 }
  0x7c   : > { %869 = vmatpush3.bf16.msra.mxu1 %v868_v21 }
  0x7d   : > { %870 = vmatprep.subr.bf16.mxu1 %v1153_v0  ;;  %p1070_p11 = pnand %p1069_p9, %p1063_p10 }
  0x7e   : > { %845 = vmatpush3.bf16.msra.mxu0 %v844_v30 }
  0x7f   : > { %846 = vmatprep.subr.bf16.mxu0 %v1153_v0 }
  0x80   : > { %872 = vmatpush3.bf16.msra.mxu1 %v871_v27 }
  0x81   : > { %873 = vmatprep.subr.bf16.mxu1 %v1153_v0 }
  0x82   : > { %848 = vmatpush3.bf16.msra.mxu0 %v847_v36 }
  0x83   : > { %849 = vmatprep.subr.bf16.mxu0 %v1153_v0 }
  0x84   : > { %875 = vmatpush3.bf16.msra.mxu1 %v874_v33 }
  0x85   : > { %876 = vmatprep.subr.bf16.mxu1 %v1153_v0 }
  0x86   : > { %851 = vmatpush3.bf16.msra.mxu0 %v850_v42 }
  0x87   : > { %852 = vmatprep.subr.bf16.mxu0 %v1153_v0 }
  0x88   : > { %878 = vmatpush3.bf16.msra.mxu1 %v877_v39 }
  0x89   : > { %879 = vmatprep.subr.bf16.mxu1 %v1153_v0 }
  0x8a   : > { %854 = vmatpush3.bf16.msra.mxu0 %v853_v46 }
  0x8b   : > { %855 = vmatprep.subr.bf16.mxu0 %v1153_v0 }
  0x8c   : > { %881 = vmatpush3.bf16.msra.mxu1 %v880_v45 }
  0x8e   : > { %857 = vmatpush3.bf16.msra.mxu0 %v856_v50 }
  0x8f   : > { %832 = vmatmul.mubr.f32.vlgmr.msra.gmra.mrb[0].mxu1 %v351_v49 }
  0x91   : > { %797 = vmatmul.mubr.f32.vlgmr.msra.gmra.mrb[0].mxu0 %v351_v49 }
 0x162   : > { %v524_v52 = vpop.f32.mrb[0].mxu1 }
 0x163   : > { %v550_v53 = vadd.f32 %v724_v51, %v524_v52  ;;  %v833_v54 = vpop.f32.mrb[1].mxu1 }
 0x164   : > { %v435_v56 = vpop.f32.mrb[0].mxu0 }
 0x165   : > { %v725_v55 = vmul.f32 -1.442695, %v550_v53  ;;  %v798_v57 = vpop.f32.mrb[1].mxu0  ;;  %v541_v61 = vadd.f32 %v723_v60, %v435_v56 }
 0x167   : > { %970 = vpow2.f32 %v725_v55 }
 0x171   : > { %v971_v58 = vpop.eup %970 }
 0x172   : > { %v554_v59 = vadd.f32 1.0, %v971_v58 }
 0x174   : > { %972 = vrcp.f32 %v554_v59 }
 0x17e   : > { %v973_v62 = vpop.eup %972 }
 0x17f   : > { %v557_v63 = vmul.f32 %v973_v62, %v541_v61 }
 0x181   : > { %558 = vst [vmem:[%s336_s9] sm:$0xff] %v557_v63 }
 0x182   : > { %1073 = shalt.err (!%p1070_p11)
}
 0x183   : > { %s1074_s13 = scalar_lea.hbm %s1417_s14, 128  ;;  %s1078_s30 = scalar_lea.hbm %s1471_s5, 256 }
 0x184   : > { %p1075_p0 = scmp.ne.s32.totalorder %s1417_s14, %s1074_s13  ;;  %p1079_p6 = scmp.lt.u32.totalorder %s1417_s14, %s1471_s5 }
 0x185   : > { %p1080_p7 = scmp.lt.u32.totalorder %s1078_s30, %s1074_s13  ;;  %p1082_p8 = scmp.lt.u32.totalorder %s1074_s13, %s1417_s14 }
 0x186   : > { %p1076_p4 = pnand %p1075_p0, %p1486_p12 }
 0x187   : > { %p1081_p2 = por %p1080_p7, %p1079_p6 }
 0x188   : > { %p1077_p13 = pneg %p1076_p4 }
 0x189   : > { %p1083_p1 = por %p1082_p8, %p1081_p2 }
 0x18b   : > { %p1084_p10 = pnand %p1083_p1, %p1077_p13 }
 0x18d   : > { %1087 = shalt.err (!%p1084_p10)
}
 0x18e   : > { %892 = dma.vmem_to_hbm [thread:$0]  (%p1486_p12), %s1419_s11, 128, %s1417_s14, %s560_s10  }
 0x18f PF: > { %s586_s9 = sand.u32 1, %s1126_s18   ;;  %p1487_p3 = scmp.ne.s32.totalorder %s1479_s29, 0 }
 0x190   : > { %p1488_p5 = scmp.ge.s32.totalorder %s1146_s23, 2  ;;  %s587_s15 = scalar_lea.sflag [#allocation6], %s586_s9 }
 0x192   : > { %p906_p9 = pnand %p1488_p5, %p1487_p3 }
 0x194   : > { %1121 = dma.done.wait (!%p906_p9), %s587_s15, 128  }
 0x195   : > { %1123 = vsyncadd (!%p906_p9), %s587_s15, 4294967168  ;;  %s22_s23 = sadd.s32 1, %s1146_s23   ;;  %s1489_s18 = smov %s1130_s19 }
 0x196   : > { %p19_p11 = scmp.ge.s32.totalorder %s22_s23, 4   ;;  %s1490_s19 = smov %s1134_s20 }
 0x197   : > { %s1491_s20 = smov %s1329_s6  ;;  %s1492_s21 = smov %s1142_s22 }
 0x198   : > { %s1493_s22 = smov %s1495_s12  ;;  %21 = sbr.rel (!%p19_p11) target bundleno = 7 (0x7), region = 109 }
 0x19f   :  { %592 = vsyncpa [#allocation5], 1 }
 0x1a0   :  { %594 = vsyncpa [#allocation5 + $0x1], 1 }
 0x1a1   :  { %595 = vsyncpa [#allocation8], 1 }
 0x1a2   :  { %596 = vsyncpa [#allocation6], 1 }
 0x1a3   :  { %598 = vsyncpa [#allocation6 + $0x1], 1 }

</bundles_post_ra>
